<compile_context>
chip_gen: v6e
topology: v6e:2x2x1
jax: 0.10.0
libtpu: 0.0.40
codegen_flags: <defaults>
</compile_context>

<pallas_src>
import jax
import jax.numpy as jnp
from jax.experimental import pallas as pl
from jax.experimental.pallas import tpu as pltpu


def _cdiv(a, b):
    return -(-a // b)


def _round_up(x, m):
    return _cdiv(x, m) * m


def _chip_plan():
    """Per-generation (tile_n_max, vmem_limit_bytes, dimension_semantics)."""
    kind = ""
    try:
        kind = jax.devices()[0].device_kind.lower()
    except Exception:
        pass
    if "v7" in kind or "7x" in kind:
        # v7x: 64 MiB physical VMEM, 2 TensorCores -> smaller tile, split the
        # batch grid across both cores.
        sem = ("parallel",)
        try:
            sem = (pltpu.CORE_PARALLEL,)
        except AttributeError:
            pass
        return 4096, 40 << 20, sem
    # v5e / v6e: 128 MiB physical VMEM, 1 TensorCore.
    return 8192, 64 << 20, ("parallel",)


def _mlp_kernel(x_ref, w1_ref, b1_ref, w2_ref, b2_ref, w3_ref, b3_ref,
                w45_ref, b45_ref, u_ref, fcoef_ref):
    """One (tile_n, ...) batch tile of the NeuralNetwork forward.

    x_ref    : (T, 4) bf16 flattened input tile (nn.Flatten(0,1) in wrapper)
    w1..w3   : bf16 weights (in, out); b1..b3 f32 (1, out)
    w45/b45  : folded fc4 * cos(omega*t) * fc5 map, bf16 (k, 2) / f32 (1, 2)
    outputs  : u_t (T, 2) f32,  F_coefficients (T, k) f32
    """
    x = x_ref[...]                                                    # bf16

    # fc1 + tanh  (f32 accumulate / bias / activation; single cast to bf16)
    h1 = jnp.tanh(
        jnp.dot(x, w1_ref[...], preferred_element_type=jnp.float32)
        + b1_ref[...]).astype(jnp.bfloat16)
    # fc2 + tanh
    h2 = jnp.tanh(
        jnp.dot(h1, w2_ref[...], preferred_element_type=jnp.float32)
        + b2_ref[...]).astype(jnp.bfloat16)
    # fc3 + exact sigmoid -> F_coefficients (returned tensor, keep exact)
    z3 = jnp.dot(h2, w3_ref[...], preferred_element_type=jnp.float32) \
        + b3_ref[...]
    f_coef = 1.0 / (1.0 + jnp.exp(-z3))                               # f32
    fcoef_ref[...] = f_coef.astype(fcoef_ref.dtype)

    # folded fc4 -> Re(exp(i*omega*t)) -> fc5
    u = jnp.dot(f_coef.astype(jnp.bfloat16), w45_ref[...],
                preferred_element_type=jnp.float32) + b45_ref[...]    # (T, 2)
    u_ref[...] = u.astype(u_ref.dtype)


@jax.jit
def neural_network_forward(seed, omega, t, params):
    """seed: (B0, B1, 4) -> flattened to (B0*B1, 4) like nn.Flatten(0, 1)."""
    (w1, b1, w2, b2, w3, b3, w4, b4, w5, b5) = params

    x = seed.reshape((-1,) + seed.shape[2:]).astype(jnp.bfloat16)     # (N, 4)
    n = x.shape[0]
    k = omega.shape[0]

    # Fold fc4 -> complex_exponential -> fc5 into a single (k, 2) affine map:
    #   u = ((F @ w4 + b4) * cos(omega*t)) @ w5 + b5
    #     =  F @ (w4 @ (c[:,None] * w5)) + (b4 @ (c[:,None] * w5) + b5)
    t32 = jnp.asarray(t, jnp.float32)
    c = jnp.cos(omega.astype(jnp.float32) * t32)                      # (k,)
    cw5 = c[:, None] * w5                                             # (k, 2)
    w45 = w4 @ cw5                                                    # (k, 2)
    b45 = b4 @ cw5 + b5                                               # (1, 2)

    # bf16 MXU operands; biases stay f32 (added after f32 accumulation).
    w1b, w2b, w3b, w45b = (w.astype(jnp.bfloat16) for w in (w1, w2, w3, w45))

    # Generation-aware batch tiling: large, balanced tiles; weights resident.
    tile_max, vmem_limit, dim_sem = _chip_plan()
    num_tiles = _cdiv(n, tile_max)
    tile_n = _round_up(_cdiv(n, num_tiles), 8)
    n_pad = num_tiles * tile_n
    if n_pad != n:
        x = jnp.pad(x, ((0, n_pad - n), (0, 0)))

    flops = 2 * n_pad * int(w1b.size + w2b.size + w3b.size + w45b.size)
    transcendentals = n_pad * int(b1.size + b2.size + k)
    bytes_accessed = n_pad * (4 * 2 + 2 * 4 + k * 4) + sum(
        int(a.size) * a.dtype.itemsize
        for a in (w1b, b1, w2b, b2, w3b, b3, w45b, b45))

    def resident(arr):
        return pl.BlockSpec(arr.shape, lambda i: (0, 0))

    u_pad, f_pad = pl.pallas_call(
        _mlp_kernel,
        out_shape=(
            jax.ShapeDtypeStruct((n_pad, 2), jnp.float32),
            jax.ShapeDtypeStruct((n_pad, k), jnp.float32),   # unpadded k
        ),
        grid=(num_tiles,),
        in_specs=[
            pl.BlockSpec((tile_n, 4), lambda i: (i, 0)),              # x tile
            resident(w1b), resident(b1),
            resident(w2b), resident(b2),
            resident(w3b), resident(b3),
            resident(w45b), resident(b45),
        ],
        out_specs=(
            pl.BlockSpec((tile_n, 2), lambda i: (i, 0)),              # u_t
            pl.BlockSpec((tile_n, k), lambda i: (i, 0)),              # F_coef
        ),
        compiler_params=pltpu.CompilerParams(
            dimension_semantics=dim_sem,
            vmem_limit_bytes=vmem_limit),
        cost_estimate=pl.CostEstimate(
            flops=flops,
            transcendentals=transcendentals,
            bytes_accessed=bytes_accessed),
    )(x, w1b, b1, w2b, b2, w3b, b3, w45b, b45)

    if n_pad != n:        # static condition; no-op (no copy) when n == n_pad
        u_pad, f_pad = u_pad[:n], f_pad[:n]
    return u_pad, f_pad


def init_params(key, no_omega_steps):
    """torch.nn.Linear default init (U[-1/sqrt(in), 1/sqrt(in)]).
    Weights stored transposed, i.e. shape (in, out); biases (1, out)."""
    dims = [(4, 32), (32, 128), (128, no_omega_steps),
            (no_omega_steps, no_omega_steps), (no_omega_steps, 2)]
    params = []
    for (fan_in, fan_out) in dims:
        key, kw, kb = jax.random.split(key, 3)
        bound = 1.0 / jnp.sqrt(float(fan_in))
        w = jax.random.uniform(kw, (fan_in, fan_out), jnp.float32,
                               minval=-bound, maxval=bound)
        b = jax.random.uniform(kb, (1, fan_out), jnp.float32,
                               minval=-bound, maxval=bound)
        params += [w, b]
    return tuple(params)


def reference_forward(seed, omega, t, params):
    """Pure-JAX f32 reference of the PyTorch forward (original semantics)."""
    (w1, b1, w2, b2, w3, b3, w4, b4, w5, b5) = params
    x = seed.reshape((-1,) + seed.shape[2:]).astype(jnp.float32)
    h1 = jnp.tanh(x @ w1 + b1)
    h2 = jnp.tanh(h1 @ w2 + b2)
    f_coef = jax.nn.sigmoid(h2 @ w3 + b3)
    g = f_coef @ w4 + b4
    f_t = jnp.real(g * jnp.exp(1j * omega[None, :] * t))
    u = f_t @ w5 + b5
    return u, f_coef


if __name__ == "__main__":
    no_omega_steps = 64          # omega_step_no
    omega_i, omega_f = 1.0, 10.0
    t_val = 0.37

    key = jax.random.PRNGKey(0)
    key, kseed, kodd, kbig = jax.random.split(key, 4)

    omega = jnp.linspace(omega_i, omega_f, no_omega_steps, dtype=jnp.float32)
    params = init_params(jax.random.PRNGKey(1), no_omega_steps)

    # Small case: seed (2, 4, 4) -> Flatten(0, 1) -> (8, 4)
    seed = jax.random.normal(kseed, (2, 4, 4), dtype=jnp.float32)
    u_t, f_coef = neural_network_forward(seed, omega, t_val, params)
    jax.block_until_ready((u_t, f_coef))
    u_ref, f_ref = reference_forward(seed, omega, t_val, params)
    assert u_t.shape == (8, 2) and f_coef.shape == (8, no_omega_steps)
    # bf16 matmul operands -> loose tolerance vs f32 reference.
    assert jnp.allclose(u_t, u_ref, atol=5e-2, rtol=5e-2)
    assert jnp.allclose(f_coef, f_ref, atol=5e-2, rtol=5e-2)

    # Odd row count exercising row padding + output row slicing (N=9 -> 16).
    seed_odd = jax.random.normal(kodd, (3, 3, 4), dtype=jnp.float32)
    u_o, f_o = neural_network_forward(seed_odd, omega, t_val, params)
    jax.block_until_ready((u_o, f_o))
    u_or, f_or = reference_forward(seed_odd, omega, t_val, params)
    assert u_o.shape == (9, 2) and f_o.shape == (9, no_omega_steps)
    assert jnp.allclose(u_o, u_or, atol=5e-2, rtol=5e-2)
    assert jnp.allclose(f_o, f_or, atol=5e-2, rtol=5e-2)

    # Larger case exercising a multi-tile batch grid (N = 10000 rows).
    seed_big = jax.random.normal(kbig, (100, 100, 4), dtype=jnp.float32)
    u_b, f_b = neural_network_forward(seed_big, omega, t_val, params)
    jax.block_until_ready((u_b, f_b))
    u_br, f_br = reference_forward(seed_big, omega, t_val, params)
    assert u_b.shape == (10000, 2) and f_b.shape == (10000, no_omega_steps)
    assert jnp.allclose(u_b, u_br, atol=5e-2, rtol=5e-2)
    assert jnp.allclose(f_b, f_br, atol=5e-2, rtol=5e-2)

    print("KERNEL_OK")
</pallas_src>

<mosaic_0001>
module attributes {stable_mosaic.version = 11 : i64} {
  func.func @_mlp_kernel(%arg0: i32, %arg1: memref<8x4xbf16, #tpu.memory_space<vmem>>, %arg2: memref<4x32xbf16, #tpu.memory_space<vmem>>, %arg3: memref<1x32xf32, #tpu.memory_space<vmem>>, %arg4: memref<32x128xbf16, #tpu.memory_space<vmem>>, %arg5: memref<1x128xf32, #tpu.memory_space<vmem>>, %arg6: memref<128x64xbf16, #tpu.memory_space<vmem>>, %arg7: memref<1x64xf32, #tpu.memory_space<vmem>>, %arg8: memref<64x2xbf16, #tpu.memory_space<vmem>>, %arg9: memref<1x2xf32, #tpu.memory_space<vmem>>, %arg10: memref<8x2xf32, #tpu.memory_space<vmem>>, %arg11: memref<8x64xf32, #tpu.memory_space<vmem>>) attributes {dimension_semantics = [#tpu.dimension_semantics<parallel>], iteration_bounds = array<i64: 1>, scalar_prefetch = 0 : i64, scratch_operands = 0 : i64, tpu.core_type = #tpu.core_type<tc>, window_params = [{transform_indices = @transform_0, window_bounds = array<i64: 8, 4>}, {pipeline_mode = #tpu.pipeline_mode<synchronous>, transform_indices = @transform_1, window_bounds = array<i64: 4, 32>}, {pipeline_mode = #tpu.pipeline_mode<synchronous>, transform_indices = @transform_2, window_bounds = array<i64: 1, 32>}, {pipeline_mode = #tpu.pipeline_mode<synchronous>, transform_indices = @transform_3, window_bounds = array<i64: 32, 128>}, {pipeline_mode = #tpu.pipeline_mode<synchronous>, transform_indices = @transform_4, window_bounds = array<i64: 1, 128>}, {pipeline_mode = #tpu.pipeline_mode<synchronous>, transform_indices = @transform_5, window_bounds = array<i64: 128, 64>}, {pipeline_mode = #tpu.pipeline_mode<synchronous>, transform_indices = @transform_6, window_bounds = array<i64: 1, 64>}, {pipeline_mode = #tpu.pipeline_mode<synchronous>, transform_indices = @transform_7, window_bounds = array<i64: 64, 2>}, {pipeline_mode = #tpu.pipeline_mode<synchronous>, transform_indices = @transform_8, window_bounds = array<i64: 1, 2>}, {transform_indices = @transform_9, window_bounds = array<i64: 8, 2>}, {transform_indices = @transform_10, window_bounds = array<i64: 8, 64>}]} {
    %c0 = arith.constant 0 : index
    %c0_0 = arith.constant 0 : index
    %0 = vector.load %arg1[%c0, %c0_0] : memref<8x4xbf16, #tpu.memory_space<vmem>>, vector<8x4xbf16>
    %c0_1 = arith.constant 0 : index
    %c0_2 = arith.constant 0 : index
    %1 = vector.load %arg2[%c0_1, %c0_2] : memref<4x32xbf16, #tpu.memory_space<vmem>>, vector<4x32xbf16>
    %cst = arith.constant dense<0.000000e+00> : vector<8x32xf32>
    %2 = tpu.matmul %0, %1, %cst {dimension_numbers = #tpu.dot_dimension_numbers<[1], [0], [0], [1], [0, 0, 1, 1], [], []>} : vector<8x4xbf16>, vector<4x32xbf16>, vector<8x32xf32> -> vector<8x32xf32>
    %c0_3 = arith.constant 0 : index
    %c0_4 = arith.constant 0 : index
    %3 = vector.load %arg3[%c0_3, %c0_4] : memref<1x32xf32, #tpu.memory_space<vmem>>, vector<1x32xf32>
    %4 = vector.broadcast %3 : vector<1x32xf32> to vector<8x32xf32>
    %5 = arith.addf %2, %4 : vector<8x32xf32>
    %6 = math.tanh %5 : vector<8x32xf32>
    %7 = arith.truncf %6 : vector<8x32xf32> to vector<8x32xbf16>
    %c0_5 = arith.constant 0 : index
    %c0_6 = arith.constant 0 : index
    %8 = vector.load %arg4[%c0_5, %c0_6] : memref<32x128xbf16, #tpu.memory_space<vmem>>, vector<32x128xbf16>
    %cst_7 = arith.constant dense<0.000000e+00> : vector<8x128xf32>
    %9 = tpu.matmul %7, %8, %cst_7 {dimension_numbers = #tpu.dot_dimension_numbers<[1], [0], [0], [1], [0, 0, 1, 1], [], []>} : vector<8x32xbf16>, vector<32x128xbf16>, vector<8x128xf32> -> vector<8x128xf32>
    %c0_8 = arith.constant 0 : index
    %c0_9 = arith.constant 0 : index
    %10 = vector.load %arg5[%c0_8, %c0_9] : memref<1x128xf32, #tpu.memory_space<vmem>>, vector<1x128xf32>
    %11 = vector.broadcast %10 : vector<1x128xf32> to vector<8x128xf32>
    %12 = arith.addf %9, %11 : vector<8x128xf32>
    %13 = math.tanh %12 : vector<8x128xf32>
    %14 = arith.truncf %13 : vector<8x128xf32> to vector<8x128xbf16>
    %c0_10 = arith.constant 0 : index
    %c0_11 = arith.constant 0 : index
    %15 = vector.load %arg6[%c0_10, %c0_11] : memref<128x64xbf16, #tpu.memory_space<vmem>>, vector<128x64xbf16>
    %cst_12 = arith.constant dense<0.000000e+00> : vector<8x64xf32>
    %16 = tpu.matmul %14, %15, %cst_12 {dimension_numbers = #tpu.dot_dimension_numbers<[1], [0], [0], [1], [0, 0, 1, 1], [], []>} : vector<8x128xbf16>, vector<128x64xbf16>, vector<8x64xf32> -> vector<8x64xf32>
    %c0_13 = arith.constant 0 : index
    %c0_14 = arith.constant 0 : index
    %17 = vector.load %arg7[%c0_13, %c0_14] : memref<1x64xf32, #tpu.memory_space<vmem>>, vector<1x64xf32>
    %18 = vector.broadcast %17 : vector<1x64xf32> to vector<8x64xf32>
    %19 = arith.addf %16, %18 : vector<8x64xf32>
    %cst_15 = arith.constant 0.000000e+00 : f32
    %20 = vector.broadcast %cst_15 : f32 to vector<8x64xf32>
    %21 = arith.subf %20, %19 : vector<8x64xf32>
    %22 = math.exp %21 : vector<8x64xf32>
    %cst_16 = arith.constant 1.000000e+00 : f32
    %23 = vector.broadcast %cst_16 : f32 to vector<8x64xf32>
    %24 = arith.addf %23, %22 : vector<8x64xf32>
    %cst_17 = arith.constant 1.000000e+00 : f32
    %25 = vector.broadcast %cst_17 : f32 to vector<8x64xf32>
    %26 = arith.divf %25, %24 : vector<8x64xf32>
    %c0_18 = arith.constant 0 : index
    %c0_19 = arith.constant 0 : index
    %27 = vector.load %arg11[%c0_18, %c0_19] : memref<8x64xf32, #tpu.memory_space<vmem>>, vector<8x64xf32>
    tpu.vector_store %arg11[%c0_18, %c0_19], %26 {strides = array<i32>} : memref<8x64xf32, #tpu.memory_space<vmem>>, vector<8x64xf32>,
    %28 = arith.truncf %26 : vector<8x64xf32> to vector<8x64xbf16>
    %c0_20 = arith.constant 0 : index
    %c0_21 = arith.constant 0 : index
    %29 = vector.load %arg8[%c0_20, %c0_21] : memref<64x2xbf16, #tpu.memory_space<vmem>>, vector<64x2xbf16>
    %cst_22 = arith.constant dense<0.000000e+00> : vector<8x2xf32>
    %30 = tpu.matmul %28, %29, %cst_22 {dimension_numbers = #tpu.dot_dimension_numbers<[1], [0], [0], [1], [0, 0, 1, 1], [], []>} : vector<8x64xbf16>, vector<64x2xbf16>, vector<8x2xf32> -> vector<8x2xf32>
    %c0_23 = arith.constant 0 : index
    %c0_24 = arith.constant 0 : index
    %31 = vector.load %arg9[%c0_23, %c0_24] : memref<1x2xf32, #tpu.memory_space<vmem>>, vector<1x2xf32>
    %32 = vector.broadcast %31 : vector<1x2xf32> to vector<8x2xf32>
    %33 = arith.addf %30, %32 : vector<8x2xf32>
    %c0_25 = arith.constant 0 : index
    %c0_26 = arith.constant 0 : index
    %34 = vector.load %arg10[%c0_25, %c0_26] : memref<8x2xf32, #tpu.memory_space<vmem>>, vector<8x2xf32>
    tpu.vector_store %arg10[%c0_25, %c0_26], %33 {strides = array<i32>} : memref<8x2xf32, #tpu.memory_space<vmem>>, vector<8x2xf32>,
    return
  }
  func.func @transform_0(%arg0: i32) -> (i32, i32) {
    %c0_i32 = arith.constant 0 : i32
    %c0_i32_0 = arith.constant 0 : i32
    return %arg0, %c0_i32 : i32, i32
  }
  func.func @transform_1(%arg0: i32) -> (i32, i32) {
    %c0_i32 = arith.constant 0 : i32
    %c0_i32_0 = arith.constant 0 : i32
    %c0_i32_1 = arith.constant 0 : i32
    return %c0_i32, %c0_i32_0 : i32, i32
  }
  func.func @transform_2(%arg0: i32) -> (i32, i32) {
    %c0_i32 = arith.constant 0 : i32
    %c0_i32_0 = arith.constant 0 : i32
    %c0_i32_1 = arith.constant 0 : i32
    return %c0_i32, %c0_i32_0 : i32, i32
  }
  func.func @transform_3(%arg0: i32) -> (i32, i32) {
    %c0_i32 = arith.constant 0 : i32
    %c0_i32_0 = arith.constant 0 : i32
    %c0_i32_1 = arith.constant 0 : i32
    return %c0_i32, %c0_i32_0 : i32, i32
  }
  func.func @transform_4(%arg0: i32) -> (i32, i32) {
    %c0_i32 = arith.constant 0 : i32
    %c0_i32_0 = arith.constant 0 : i32
    %c0_i32_1 = arith.constant 0 : i32
    return %c0_i32, %c0_i32_0 : i32, i32
  }
  func.func @transform_5(%arg0: i32) -> (i32, i32) {
    %c0_i32 = arith.constant 0 : i32
    %c0_i32_0 = arith.constant 0 : i32
    %c0_i32_1 = arith.constant 0 : i32
    return %c0_i32, %c0_i32_0 : i32, i32
  }
  func.func @transform_6(%arg0: i32) -> (i32, i32) {
    %c0_i32 = arith.constant 0 : i32
    %c0_i32_0 = arith.constant 0 : i32
    %c0_i32_1 = arith.constant 0 : i32
    return %c0_i32, %c0_i32_0 : i32, i32
  }
  func.func @transform_7(%arg0: i32) -> (i32, i32) {
    %c0_i32 = arith.constant 0 : i32
    %c0_i32_0 = arith.constant 0 : i32
    %c0_i32_1 = arith.constant 0 : i32
    return %c0_i32, %c0_i32_0 : i32, i32
  }
  func.func @transform_8(%arg0: i32) -> (i32, i32) {
    %c0_i32 = arith.constant 0 : i32
    %c0_i32_0 = arith.constant 0 : i32
    %c0_i32_1 = arith.constant 0 : i32
    return %c0_i32, %c0_i32_0 : i32, i32
  }
  func.func @transform_9(%arg0: i32) -> (i32, i32) {
    %c0_i32 = arith.constant 0 : i32
    %c0_i32_0 = arith.constant 0 : i32
    return %arg0, %c0_i32 : i32, i32
  }
  func.func @transform_10(%arg0: i32) -> (i32, i32) {
    %c0_i32 = arith.constant 0 : i32
    %c0_i32_0 = arith.constant 0 : i32
    return %arg0, %c0_i32 : i32, i32
  }
}

</mosaic_0001>

<bundles_post_ra>
// kernel: neural_network_forward.1
= control target key start
LH: loop header
LB: loop body
LE: loop exit
PB: predicated region body
PF: predicated region fallthrough
CT: control target
= control target key end

     0   :  { %vm49_vm0 = vcmask 1041408   ;;  %v519_v1 = vmov 0.0   ;;  %vm520_vm1 = vmmov 0   ;;  %vm45_vm2 = vcmask 31744   ;;  %s666_s0 = inlined_call_operand.vmem [shape: bf16[8,4], index: 0, kind: input, shape index: {}]   ;;  %s667_s1 = inlined_call_operand.vmem [shape: bf16[4,32], index: 1, kind: input, shape index: {}]   ;;  %s668_s2 = inlined_call_operand.vmem [shape: f32[1,32], index: 2, kind: input, shape index: {}]   ;;  %s669_s3 = inlined_call_operand.vmem [shape: bf16[32,128], index: 3, kind: input, shape index: {}]   ;;  %s670_s4 = inlined_call_operand.vmem [shape: f32[1,128], index: 4, kind: input, shape index: {}]   ;;  %s671_s5 = inlined_call_operand.vmem [shape: bf16[128,64], index: 5, kind: input, shape index: {}]   ;;  %s672_s6 = inlined_call_operand.vmem [shape: f32[1,64], index: 6, kind: input, shape index: {}]   ;;  %s673_s7 = inlined_call_operand.vmem [shape: bf16[64,2], index: 7, kind: input, shape index: {}]   ;;  %s674_s8 = inlined_call_operand.vmem [shape: f32[1,2], index: 8, kind: input, shape index: {}]   ;;  %s675_s9 = inlined_call_operand.vmem [shape: f32[8,2], index: 9, kind: output, shape index: {0}]   ;;  %s676_s10 = inlined_call_operand.hbm [shape: f32[8,64], index: 10, kind: output, shape index: {1}]  }
   0x1   :  { %v37_v0 = vld [vmem:[%s667_s1] sm:$0x3]  ;;  %426 = vmatprep.subr.bf16.mxu1 %v519_v1  ;;  %428 = vmatprep.mubr.msk.bf16.mxu1 %vm520_vm1, %v519_v1 }
   0x2   :  { %v51_v2 = vsel %vm49_vm0, %v37_v0, 0  ;;  %v36_v3 = vld [vmem:[%s666_s0] sm:$0xf]  ;;  %440 = vmatprep.subr.bf16.mxu0 %v519_v1  ;;  %456 = vmatprep.mubr.msk.bf16.mxu0 %vm520_vm1, %v519_v1 }
   0x3   :  { %427 = vmatpush3.bf16.msra.mxu1 %v51_v2 }
   0x4   :  { %432 = vmatprep.subr.bf16.mxu1 %v519_v1 }
   0x6   :  { %429 = vmatmul.mubr.msk.bf16.vlgmr.msra.gmra.mxu1 %vm45_vm2, %v36_v3 }
   0x7   :  { %436 = vmatprep.mubr.msk.bf16.mxu1 %vm520_vm1, %v519_v1 }
   0x8   :  { %16 = vsyncpa [#allocation3], 0  ;;  %v475_v4 = vld [vmem:[%s669_s3 + $0x8] sm:$0xff]   ;;  %v476_v5 = vld [vmem:[%s669_s3] sm:$0xff]   ;;  %vm118_vm3 = vcmask 261120   ;;  %vm281_vm4 = vcmask 523264  }
   0x9   :  { %433 = vmatpush3.bf16.msra.mxu1 %v475_v4  ;;  %v477_v6 = vld [vmem:[%s671_s5 + $0x38] sm:$0xff]   ;;  %v478_v7 = vld [vmem:[%s671_s5 + $0x30] sm:$0xff]   ;;  %v479_v8 = vld [vmem:[%s671_s5 + $0x28] sm:$0xff]  }
   0xa   :  { %434 = vmatprep.subr.bf16.mxu1 %v519_v1  ;;  %441 = vmatpush3.bf16.msra.mxu0 %v477_v6  ;;  %v386_v9 = vld [vmem:[%s668_s2] ss:$0 sm:$0xff]  ;;  %v481_v18 = vld [vmem:[%s671_s5 + $0x18] sm:$0xff]   ;;  %v482_v19 = vld [vmem:[%s671_s5 + $0x10] sm:$0xff]  }
   0xb   :  { %442 = vmatprep.subr.bf16.mxu0 %v519_v1  ;;  %v480_v17 = vld [vmem:[%s671_s5 + $0x20] sm:$0xff]   ;;  %v483_v20 = vld [vmem:[%s671_s5 + $0x8] sm:$0xff]   ;;  %v485_v30 = vld [vmem:[%s673_s7 + $0x18] sm:$0xff]  }
   0xc   :  { %v484_v21 = vld [vmem:[%s671_s5] sm:$0xff]   ;;  %v486_v31 = vld [vmem:[%s673_s7 + $0x10] sm:$0xff]   ;;  %v487_v32 = vld [vmem:[%s673_s7 + $0x8] sm:$0xff]  }
   0xd   :  { %435 = vmatpush3.bf16.msra.mxu1 %v476_v5  ;;  %v388_v22 = vld [vmem:[%s670_s4] ss:$0 sm:$0xff] }
   0xe   :  { %460 = vmatprep.subr.bf16.mxu1 %v519_v1  ;;  %443 = vmatpush3.bf16.msra.mxu0 %v478_v7  ;;  %v488_v33 = vld [vmem:[%s673_s7] sm:$0xff]   ;;  %s521_s7 = smov [#allocation2]  }
   0xf   :  { %444 = vmatprep.subr.bf16.mxu0 %v519_v1  ;;  %v392_v34 = vld [vmem:[%s672_s6] ss:$0 sm:$0xff]  ;;  %s376_s23 = sshll.u32 %s521_s7, 4  ;;  %s377_s23 = int_to_ptr.vmem [resolvable:$true] %s376_s23 }
  0x10   :  { %s497_s6 = scalar_lea.vmem %s377_s23, 128  ;;  %p502_p1 = scmp.lt.s32.totalorder %s377_s23, %s377_s23 }
  0x11   :  { %p498_p0 = scmp.ne.s32.totalorder %s377_s23, %s497_s6  ;;  %p503_p2 = scmp.lt.s32.totalorder %s497_s6, %s497_s6 }
  0x12   :  { %445 = vmatpush3.bf16.msra.mxu0 %v479_v8 }
  0x13   :  { %446 = vmatprep.subr.bf16.mxu0 %v519_v1  ;;  %p504_p3 = por %p503_p2, %p502_p1 }
  0x15   :  { %p505_p4 = pnand %p504_p3, %p498_p0 }
  0x16   :  { %447 = vmatpush3.bf16.msra.mxu0 %v480_v17 }
  0x17   :  { %448 = vmatprep.subr.bf16.mxu0 %v519_v1 }
  0x1a   :  { %449 = vmatpush3.bf16.msra.mxu0 %v481_v18 }
  0x1b   :  { %450 = vmatprep.subr.bf16.mxu0 %v519_v1 }
  0x1e   :  { %451 = vmatpush3.bf16.msra.mxu0 %v482_v19 }
  0x1f   :  { %452 = vmatprep.subr.bf16.mxu0 %v519_v1 }
  0x22   :  { %453 = vmatpush3.bf16.msra.mxu0 %v483_v20 }
  0x23   :  { %454 = vmatprep.subr.bf16.mxu0 %v519_v1 }
  0x26   :  { %455 = vmatpush3.bf16.msra.mxu0 %v484_v21 }
  0xc6   :  { %v87_v10 = vpop.f32.mrf.mxu1 }
  0xc7   :  { %v88_v11 = vadd.f32 %v386_v9, %v87_v10 }
  0xc8   :  { %v430_v12 = vpop.f32.mrf.mxu1 }
  0xc9   :  { %489 = vtanh.f32 %v88_v11 }
  0xca   :  { %v90_v13 = vpop.f32.mrf.mxu1 }
  0xcc   :  { %v431_v14 = vpop.f32.mrf.mxu1 }
  0xd6   :  { %v490_v15 = vpop.eup %489 }
  0xd7   :  { %v94_v16 = vpack.c.bf16 %v490_v15, %v490_v15 }
  0xd9   :  { %437 = vmatmul.mubr.msk.bf16.vlgmr.msra.gmra.mxu1 %vm118_vm3, %v94_v16 }
  0xda   :  { %468 = vmatprep.mubr.msk.bf16.mxu1 %vm520_vm1, %v519_v1  ;;  %461 = vmatpush3.bf16.msra.mxu1 %v485_v30 }
  0xdb   :  { %462 = vmatprep.subr.bf16.mxu1 %v519_v1 }
  0xde   :  { %463 = vmatpush3.bf16.msra.mxu1 %v486_v31 }
  0xdf   :  { %464 = vmatprep.subr.bf16.mxu1 %v519_v1 }
  0xe2   :  { %465 = vmatpush3.bf16.msra.mxu1 %v487_v32 }
  0xe3   :  { %466 = vmatprep.subr.bf16.mxu1 %v519_v1 }
  0xe6   :  { %467 = vmatpush3.bf16.msra.mxu1 %v488_v33 }
 0x199   :  { %v156_v23 = vpop.f32.mrf.mxu1 }
 0x19a   :  { %v157_v24 = vadd.f32 %v388_v22, %v156_v23 }
 0x19b   :  { %v438_v25 = vpop.f32.mrf.mxu1 }
 0x19c   :  { %491 = vtanh.f32 %v157_v24 }
 0x19d   :  { %v159_v26 = vpop.f32.mrf.mxu1 }
 0x19f   :  { %v439_v27 = vpop.f32.mrf.mxu1 }
 0x1a9   :  { %v492_v28 = vpop.eup %491 }
 0x1aa   :  { %v163_v29 = vpack.c.bf16 %v492_v28, %v492_v28 }
 0x1ac   :  { %457 = vmatmul.mubr.bf16.vlgmr.msra.gmra.mxu0 %v163_v29 }
 0x26c   :  { %v269_v35 = vpop.f32.mrf.mxu0 }
 0x26d   :  { %v270_v36 = vadd.f32 %v392_v34, %v269_v35 }
 0x26e   :  { %v458_v37 = vpop.f32.mrf.mxu0 }
 0x26f   :  { %v275_v38 = vsub.f32 0.0, %v270_v36 }
 0x270   :  { %v272_v39 = vpop.f32.mrf.mxu0 }
 0x271   :  { %v276_v40 = vmul.f32 1.442695, %v275_v38 }
 0x272   :  { %v459_v41 = vpop.f32.mrf.mxu0 }
 0x273   :  { %493 = vpow2.f32 %v276_v40 }
 0x280   :  { %v494_v42 = vpop.eup %493 }
 0x281   :  { %v278_v43 = vadd.f32 1.0, %v494_v42 }
 0x283   :  { %495 = vrcp.f32 %v278_v43 }
 0x290   :  { %v496_v44 = vpop.eup %495 }
 0x291   :  { %v283_v45 = vpack.c.bf16 %v496_v44, %v496_v44  ;;  %282 = vst.msk [vmem:[#allocation2] sm:$0xff] %vm281_vm4, %v496_v44 }
 0x293   :  { %469 = vmatmul.mubr.msk.bf16.vlgmr.msra.gmra.mxu1 %vm281_vm4, %v283_v45 }
 0x294   :  { %508 = shalt.err (!%p505_p4)
}
 0x295   :  { %379 = dma.vmem_to_hbm [thread:$0]  %s377_s23, 128, %s676_s10, [#allocation3]   ;;  %v401_v46 = vld [vmem:[%s674_s8] ss:$0 sm:$0xff]  ;;  %vm366_vm5 = vcmask 15360  }
 0x353   :  { %v360_v47 = vpop.f32.mrf.mxu1 }
 0x354   :  { %v361_v48 = vadd.f32 %v401_v46, %v360_v47 }
 0x355   :  { %v470_v49 = vpop.f32.mrf.mxu1 }
 0x356   :  { %367 = vst.msk [vmem:[%s675_s9] sm:$0xff] %vm366_vm5, %v361_v48 }
 0x357   :  { %v363_v50 = vpop.f32.mrf.mxu1 }
 0x359   :  { %v471_v51 = vpop.f32.mrf.mxu1 }
 0x35a   :  { %517 = dma.done.wait [#allocation3], 128  }
 0x35b   :  { %518 = vsyncadd [#allocation3], 4294967168 }
 0x35c   :  { %385 = vsyncpa [#allocation3], 1 }

</bundles_post_ra>
